<compile_context>
chip_gen: v7x
topology: tpu7x:2x2x1
jax: 0.10.0
libtpu: 0.0.40
codegen_flags: <defaults>
</compile_context>

<pallas_src>
import functools
import math

import jax
import jax.numpy as jnp
import numpy as np
from jax.experimental import pallas as pl
from jax.experimental.pallas import tpu as pltpu


def _powf(x, p):
    """x ** p with p a static Python float.  Small integer p -> plain VPU
    multiplies (keeps the single-slot EUP free); otherwise exp(p * log(x))."""
    p = float(p)
    if p == 1.0:
        return x
    if p.is_integer() and 2.0 <= p <= 8.0:
        acc = x
        for _ in range(int(p) - 1):
            acc = acc * x
        return acc
    return jnp.exp(jnp.float32(p) * jnp.log(x))


def _cam_pool_mlp_kernel(x_ref, w1t_ref, w2_ref, scale_ref,
                         sum_acc, max_acc, pow_acc,
                         *, powers, hw_total, hidden, factor):
    h = pl.program_id(1)
    nh = pl.num_programs(1)
    C = x_ref.shape[1]

    gen_powers = [p for p in powers if p != 1.0 and not math.isinf(p)]
    need_sum = any(p == 1.0 for p in powers)
    need_max = bool(gen_powers) or any(math.isinf(p) for p in powers)

    x = x_ref[0].astype(jnp.float32)                        # (C, T_HW)

    @pl.when(h == 0)
    def _init():
        sum_acc[...] = jnp.zeros_like(sum_acc)
        max_acc[...] = jnp.full_like(max_acc, -jnp.inf)
        pow_acc[...] = jnp.zeros_like(pow_acc)

    if need_sum:
        sum_acc[...] = sum_acc[...] + jnp.sum(x, axis=-1, keepdims=True)

    if need_max:
        m_old = max_acc[...]                                # (C, 1)
        m_new = jnp.maximum(m_old, jnp.max(x, axis=-1, keepdims=True))
        max_acc[...] = m_new
        if gen_powers:
            # One reciprocal per channel column, then VPU multiplies (review item);
            # note x/x_max is NaN/Inf if a whole row is zero, same as PyTorch.
            inv_m = 1.0 / m_new
            ratio = x * inv_m                               # (C, T_HW)
            is_first = h == 0
            for g, p in enumerate(gen_powers):
                tile_ps = jnp.sum(_powf(ratio, p), axis=-1, keepdims=True)
                # flash-style rescale of previously accumulated (x/m_old)**p sums
                carried = jnp.where(is_first, 0.0,
                                    pow_acc[g] * _powf(m_old * inv_m, p))
                pow_acc[g] = carried + tile_ps

    @pl.when(h == nh - 1)
    def _finalize():
        inv_hw = jnp.float32(1.0 / hw_total)
        pools = []
        gi = 0
        for p in powers:
            if p == 1.0:
                pools.append(sum_acc[...] * inv_hw)
            elif math.isinf(p):
                pools.append(max_acc[...])
            else:
                pools.append(_powf(pow_acc[gi] * inv_hw, 1.0 / p) * max_acc[...])
                gi += 1
        # Tiny MLP (Linear C->hidden, ReLU, Linear hidden->C), summed over pools,
        # evaluated with broadcast + sublane-reduce ops (hidden = ceil(C/16) is small).
        # TODO(synk): for very large C/hidden this finalize MLP could use jnp.dot (MXU).
        w1t = w1t_ref[...].astype(jnp.float32)              # (C, hidden)
        w2 = w2_ref[...].astype(jnp.float32)                # (C, hidden)
        att_sum = jnp.zeros((C, 1), jnp.float32)
        for pool in pools:
            for j in range(hidden):
                pre = jnp.sum(w1t[:, j:j + 1] * pool, axis=0, keepdims=True)  # (1,1)
                hj = jnp.maximum(pre, 0.0)
                att_sum = att_sum + w2[:, j:j + 1] * hj
        z = att_sum * jnp.float32(1.0 / factor)
        y = 1.0 / (1.0 + jnp.exp(-z))                       # sigmoid, (C, 1)
        scale_ref[0] = (y + 1.0).astype(scale_ref.dtype)


def _cam_scale_kernel(x_ref, scale_ref, o_ref):
    s = scale_ref[...]                                      # (1, C, 1) f32
    o_ref[...] = (x_ref[...].astype(jnp.float32) * s).astype(o_ref.dtype)


def _pick_hw_tile(hw: int, c: int, itemsize: int) -> int:
    """Largest lane tile (multiple of 128 dividing HW) with block <= ~2 MiB."""
    budget = 2 * 1024 * 1024
    if c * hw * itemsize <= budget or hw % 128 != 0:
        return hw            # tiny per-batch slab, or HW not 128-aligned: one tile
    max_lanes = max(128, budget // (c * itemsize))
    best, cand = 128, 256
    while cand <= max_lanes:
        if hw % cand == 0:
            best = cand
        cand += 128
    return best


def cam_forward(x, w1, w2, *, power_mean=(1.0, float("inf")), factor=1.0,
                hw_tile=None):
    """CAM forward.  x: (B,C,H,W); w1: (hidden,C); w2: (C,hidden) (PyTorch Linear layout)."""
    B, C, H, W = x.shape
    HW = H * W
    powers = tuple(float(p) for p in
                   (power_mean if hasattr(power_mean, "__iter__") else [power_mean]))
    assert all(p > 0 for p in powers)
    hidden = w1.shape[0]
    assert w1.shape == (hidden, C) and w2.shape == (C, hidden)
    n_gen = sum(1 for p in powers if p != 1.0 and not math.isinf(p))

    x3 = x.reshape(B, C, HW)
    w1t = jnp.transpose(w1)            # (C, hidden): channels on sublanes in-kernel

    t_hw = int(hw_tile) if hw_tile is not None else _pick_hw_tile(HW, C, x.dtype.itemsize)
    assert HW % t_hw == 0 and (t_hw == HW or t_hw % 128 == 0), "bad hw_tile"
    n_hw = HW // t_hw

    pool_mlp = functools.partial(_cam_pool_mlp_kernel, powers=powers,
                                 hw_total=HW, hidden=hidden, factor=float(factor))

    scale = pl.pallas_call(
        pool_mlp,
        out_shape=jax.ShapeDtypeStruct((B, C, 1), jnp.float32),
        grid_spec=pltpu.PrefetchScalarGridSpec(
            num_scalar_prefetch=0,
            grid=(B, n_hw),
            in_specs=[
                pl.BlockSpec((1, C, t_hw), lambda b, h: (b, 0, h)),
                pl.BlockSpec((C, hidden), lambda b, h: (0, 0)),
                pl.BlockSpec((C, hidden), lambda b, h: (0, 0)),
            ],
            out_specs=pl.BlockSpec((1, C, 1), lambda b, h: (b, 0, 0)),
            scratch_shapes=[
                pltpu.VMEM((C, 1), jnp.float32),                  # running sum (p == 1)
                pltpu.VMEM((C, 1), jnp.float32),                  # running max
                pltpu.VMEM((max(n_gen, 1), C, 1), jnp.float32),   # rescaled power sums
            ],
        ),
        compiler_params=pltpu.CompilerParams(
            dimension_semantics=("parallel", "arbitrary")),
    )(x3, w1t, w2)

    out3 = pl.pallas_call(
        _cam_scale_kernel,
        out_shape=jax.ShapeDtypeStruct((B, C, HW), x.dtype),
        grid_spec=pltpu.PrefetchScalarGridSpec(
            num_scalar_prefetch=0,
            grid=(B, n_hw),
            in_specs=[
                pl.BlockSpec((1, C, t_hw), lambda b, h: (b, 0, h)),
                pl.BlockSpec((1, C, 1), lambda b, h: (b, 0, 0)),
            ],
            out_specs=pl.BlockSpec((1, C, t_hw), lambda b, h: (b, 0, h)),
        ),
        compiler_params=pltpu.CompilerParams(
            dimension_semantics=("parallel", "parallel")),
    )(x3, scale)

    return out3.reshape(B, C, H, W)


def _reference_cam(x, w1, w2, power_mean, factor):
    """Pure-JAX mirror of the PyTorch CAM.forward (used only for verification)."""
    B, C, H, W = x.shape
    xv = x.reshape(B, C, H * W)
    pools = []
    for p in power_mean:
        p = float(p)
        if p == 1.0:
            pools.append(jnp.mean(xv, axis=-1, keepdims=True))
            continue
        x_max = jnp.max(xv, axis=-1, keepdims=True)
        if math.isinf(p):
            pools.append(x_max)
        else:
            r = jnp.mean((xv / x_max) ** p, axis=-1, keepdims=True)
            pools.append(r ** (1.0 / p) * x_max)
    x_red = jnp.concatenate(pools, axis=-1)                  # (B, C, n_pool)
    att_in = jnp.transpose(x_red, (0, 2, 1))                 # (B, n_pool, C)
    hmid = jax.nn.relu(jnp.einsum("bkc,hc->bkh", att_in, w1))
    att = jnp.einsum("bkh,ch->bkc", hmid, w2)
    y = jax.nn.sigmoid(jnp.sum(att, axis=1) / factor)        # (B, C)
    return (y[:, :, None, None] + 1.0) * x


if __name__ == "__main__":
    key = jax.random.PRNGKey(0)
    B, C, H, W = 2, 4, 16, 16
    reduction_ratio = 16
    hidden = math.ceil(C / reduction_ratio)                  # = 1

    kx, kp, kw1, kw2 = jax.random.split(key, 4)
    x = jax.random.normal(kx, (B, C, H, W), dtype=jnp.float32)
    # Positive feature maps for the general-p config (fractional powers of
    # negative ratios are NaN in PyTorch too).
    x_pos = jax.random.uniform(kp, (B, C, H, W), dtype=jnp.float32,
                               minval=0.05, maxval=2.0)
    w1 = jax.random.normal(kw1, (hidden, C), dtype=jnp.float32) / math.sqrt(C)
    w2 = jax.random.normal(kw2, (C, hidden), dtype=jnp.float32) / math.sqrt(hidden)

    configs = [
        (x, (1.0, float("inf")), None),          # CAM defaults, auto (single) HW tile
        (x, (1.0, float("inf")), 128),           # forced HW tiling: exercises accumulation
        (x_pos, (1.0, 3.0, float("inf")), 128),  # general-p pool, online-rescaled tiling
    ]
    for xi, powers, tile in configs:
        out = cam_forward(xi, w1, w2, power_mean=powers, factor=1.0, hw_tile=tile)
        jax.block_until_ready(out)
        ref = _reference_cam(xi, w1, w2, powers, 1.0)
        np.testing.assert_allclose(np.asarray(out), np.asarray(ref),
                                   rtol=2e-4, atol=2e-5)
        assert out.shape == xi.shape

    print("KERNEL_OK")
</pallas_src>

<mosaic_0001>
module attributes {stable_mosaic.version = 11 : i64} {
  func.func @_cam_pool_mlp_kernel(%arg0: i32, %arg1: i32, %arg2: memref<1x4x256xf32, #tpu.memory_space<vmem>>, %arg3: memref<4x1xf32, #tpu.memory_space<vmem>>, %arg4: memref<4x1xf32, #tpu.memory_space<vmem>>, %arg5: memref<1x4x1xf32, #tpu.memory_space<vmem>>, %arg6: memref<4x1xf32, #tpu.memory_space<vmem>>, %arg7: memref<4x1xf32, #tpu.memory_space<vmem>>, %arg8: memref<1x4x1xf32, #tpu.memory_space<vmem>>) attributes {dimension_semantics = [#tpu.dimension_semantics<parallel>, #tpu.dimension_semantics<arbitrary>], iteration_bounds = array<i64: 2, 1>, scalar_prefetch = 0 : i64, scratch_operands = 3 : i64, tpu.core_type = #tpu.core_type<tc>, window_params = [{transform_indices = @transform_0, window_bounds = array<i64: 1, 4, 256>}, {pipeline_mode = #tpu.pipeline_mode<synchronous>, transform_indices = @transform_1, window_bounds = array<i64: 4, 1>}, {pipeline_mode = #tpu.pipeline_mode<synchronous>, transform_indices = @transform_2, window_bounds = array<i64: 4, 1>}, {transform_indices = @transform_3, window_bounds = array<i64: 1, 4, 1>}]} {
    %c0 = arith.constant 0 : index
    %c0_0 = arith.constant 0 : index
    %c0_1 = arith.constant 0 : index
    %0 = vector.load %arg2[%c0, %c0_0, %c0_1] : memref<1x4x256xf32, #tpu.memory_space<vmem>>, vector<1x4x256xf32>
    %1 = vector.shape_cast %0 : vector<1x4x256xf32> to vector<4x256xf32>
    %c0_i32 = arith.constant 0 : i32
    %2 = arith.cmpi eq, %arg1, %c0_i32 : i32
    %3 = arith.extui %2 : i1 to i32
    %c0_i32_2 = arith.constant 0 : i32
    %4 = arith.cmpi ne, %3, %c0_i32_2 : i32
    scf.if %4 {
      %cst_14 = arith.constant 0.000000e+00 : f32
      %18 = vector.broadcast %cst_14 : f32 to vector<4x1xf32>
      %c0_15 = arith.constant 0 : index
      %c0_16 = arith.constant 0 : index
      %19 = vector.load %arg6[%c0_15, %c0_16] : memref<4x1xf32, #tpu.memory_space<vmem>>, vector<4x1xf32>
      tpu.vector_store %arg6[%c0_15, %c0_16], %18 {strides = array<i32>} : memref<4x1xf32, #tpu.memory_space<vmem>>, vector<4x1xf32>,
      %cst_17 = arith.constant 0xFF800000 : f32
      %20 = vector.broadcast %cst_17 : f32 to vector<4x1xf32>
      %c0_18 = arith.constant 0 : index
      %c0_19 = arith.constant 0 : index
      %21 = vector.load %arg7[%c0_18, %c0_19] : memref<4x1xf32, #tpu.memory_space<vmem>>, vector<4x1xf32>
      tpu.vector_store %arg7[%c0_18, %c0_19], %20 {strides = array<i32>} : memref<4x1xf32, #tpu.memory_space<vmem>>, vector<4x1xf32>,
      %cst_20 = arith.constant 0.000000e+00 : f32
      %22 = vector.broadcast %cst_20 : f32 to vector<1x4x1xf32>
      %c0_21 = arith.constant 0 : index
      %c0_22 = arith.constant 0 : index
      %c0_23 = arith.constant 0 : index
      %23 = vector.load %arg8[%c0_21, %c0_22, %c0_23] : memref<1x4x1xf32, #tpu.memory_space<vmem>>, vector<1x4x1xf32>
      tpu.vector_store %arg8[%c0_21, %c0_22, %c0_23], %22 {strides = array<i32>} : memref<1x4x1xf32, #tpu.memory_space<vmem>>, vector<1x4x1xf32>,
    } else {
    }
    %c0_3 = arith.constant 0 : index
    %c0_4 = arith.constant 0 : index
    %5 = vector.load %arg6[%c0_3, %c0_4] : memref<4x1xf32, #tpu.memory_space<vmem>>, vector<4x1xf32>
    %cst = arith.constant dense<0.000000e+00> : vector<4xf32>
    %6 = vector.multi_reduction <add>, %1, %cst [1] : vector<4x256xf32> to vector<4xf32>
    %7 = vector.shape_cast %6 : vector<4xf32> to vector<4x1xf32>
    %8 = arith.addf %5, %7 : vector<4x1xf32>
    %c0_5 = arith.constant 0 : index
    %c0_6 = arith.constant 0 : index
    %9 = vector.load %arg6[%c0_5, %c0_6] : memref<4x1xf32, #tpu.memory_space<vmem>>, vector<4x1xf32>
    tpu.vector_store %arg6[%c0_5, %c0_6], %8 {strides = array<i32>} : memref<4x1xf32, #tpu.memory_space<vmem>>, vector<4x1xf32>,
    %c0_7 = arith.constant 0 : index
    %c0_8 = arith.constant 0 : index
    %10 = vector.load %arg7[%c0_7, %c0_8] : memref<4x1xf32, #tpu.memory_space<vmem>>, vector<4x1xf32>
    %cst_9 = arith.constant dense<0xFF800000> : vector<4xf32>
    %11 = vector.multi_reduction <maximumf>, %1, %cst_9 [1] : vector<4x256xf32> to vector<4xf32>
    %12 = vector.shape_cast %11 : vector<4xf32> to vector<4x1xf32>
    %13 = arith.maximumf %10, %12 : vector<4x1xf32>
    %c0_10 = arith.constant 0 : index
    %c0_11 = arith.constant 0 : index
    %14 = vector.load %arg7[%c0_10, %c0_11] : memref<4x1xf32, #tpu.memory_space<vmem>>, vector<4x1xf32>
    tpu.vector_store %arg7[%c0_10, %c0_11], %13 {strides = array<i32>} : memref<4x1xf32, #tpu.memory_space<vmem>>, vector<4x1xf32>,
    %c0_i32_12 = arith.constant 0 : i32
    %15 = arith.cmpi eq, %arg1, %c0_i32_12 : i32
    %16 = arith.extui %15 : i1 to i32
    %c0_i32_13 = arith.constant 0 : i32
    %17 = arith.cmpi ne, %16, %c0_i32_13 : i32
    scf.if %17 {
      %c0_14 = arith.constant 0 : index
      %c0_15 = arith.constant 0 : index
      %18 = vector.load %arg6[%c0_14, %c0_15] : memref<4x1xf32, #tpu.memory_space<vmem>>, vector<4x1xf32>
      %cst_16 = arith.constant 3.906250e-03 : f32
      %19 = vector.broadcast %cst_16 : f32 to vector<4x1xf32>
      %20 = arith.mulf %18, %19 : vector<4x1xf32>
      %c0_17 = arith.constant 0 : index
      %c0_18 = arith.constant 0 : index
      %21 = vector.load %arg7[%c0_17, %c0_18] : memref<4x1xf32, #tpu.memory_space<vmem>>, vector<4x1xf32>
      %c0_19 = arith.constant 0 : index
      %c0_20 = arith.constant 0 : index
      %22 = vector.load %arg3[%c0_19, %c0_20] : memref<4x1xf32, #tpu.memory_space<vmem>>, vector<4x1xf32>
      %c0_21 = arith.constant 0 : index
      %c0_22 = arith.constant 0 : index
      %23 = vector.load %arg4[%c0_21, %c0_22] : memref<4x1xf32, #tpu.memory_space<vmem>>, vector<4x1xf32>
      %cst_23 = arith.constant 0.000000e+00 : f32
      %24 = vector.broadcast %cst_23 : f32 to vector<4x1xf32>
      %25 = arith.mulf %22, %20 : vector<4x1xf32>
      %cst_24 = arith.constant dense<0.000000e+00> : vector<1xf32>
      %26 = vector.multi_reduction <add>, %25, %cst_24 [0] : vector<4x1xf32> to vector<1xf32>
      %27 = vector.shape_cast %26 : vector<1xf32> to vector<1x1xf32>
      %cst_25 = arith.constant 0.000000e+00 : f32
      %28 = vector.broadcast %cst_25 : f32 to vector<1x1xf32>
      %29 = arith.maximumf %27, %28 : vector<1x1xf32>
      %30 = vector.broadcast %29 : vector<1x1xf32> to vector<4x1xf32>
      %31 = arith.mulf %23, %30 : vector<4x1xf32>
      %32 = arith.addf %24, %31 : vector<4x1xf32>
      %33 = arith.mulf %22, %21 : vector<4x1xf32>
      %cst_26 = arith.constant dense<0.000000e+00> : vector<1xf32>
      %34 = vector.multi_reduction <add>, %33, %cst_26 [0] : vector<4x1xf32> to vector<1xf32>
      %35 = vector.shape_cast %34 : vector<1xf32> to vector<1x1xf32>
      %cst_27 = arith.constant 0.000000e+00 : f32
      %36 = vector.broadcast %cst_27 : f32 to vector<1x1xf32>
      %37 = arith.maximumf %35, %36 : vector<1x1xf32>
      %38 = vector.broadcast %37 : vector<1x1xf32> to vector<4x1xf32>
      %39 = arith.mulf %23, %38 : vector<4x1xf32>
      %40 = arith.addf %32, %39 : vector<4x1xf32>
      %cst_28 = arith.constant 1.000000e+00 : f32
      %41 = vector.broadcast %cst_28 : f32 to vector<4x1xf32>
      %42 = arith.mulf %40, %41 : vector<4x1xf32>
      %cst_29 = arith.constant 0.000000e+00 : f32
      %43 = vector.broadcast %cst_29 : f32 to vector<4x1xf32>
      %44 = arith.subf %43, %42 : vector<4x1xf32>
      %45 = math.exp %44 : vector<4x1xf32>
      %cst_30 = arith.constant 1.000000e+00 : f32
      %46 = vector.broadcast %cst_30 : f32 to vector<4x1xf32>
      %47 = arith.addf %46, %45 : vector<4x1xf32>
      %cst_31 = arith.constant 1.000000e+00 : f32
      %48 = vector.broadcast %cst_31 : f32 to vector<4x1xf32>
      %49 = arith.divf %48, %47 : vector<4x1xf32>
      %cst_32 = arith.constant 1.000000e+00 : f32
      %50 = vector.broadcast %cst_32 : f32 to vector<4x1xf32>
      %51 = arith.addf %49, %50 : vector<4x1xf32>
      %c0_33 = arith.constant 0 : index
      %c0_34 = arith.constant 0 : index
      %c0_35 = arith.constant 0 : index
      %52 = vector.load %arg5[%c0_33, %c0_34, %c0_35] : memref<1x4x1xf32, #tpu.memory_space<vmem>>, vector<1x4x1xf32>
      %53 = vector.shape_cast %52 : vector<1x4x1xf32> to vector<4x1xf32>
      %54 = vector.shape_cast %51 : vector<4x1xf32> to vector<1x4x1xf32>
      tpu.vector_store %arg5[%c0_33, %c0_34, %c0_35], %54 {strides = array<i32>} : memref<1x4x1xf32, #tpu.memory_space<vmem>>, vector<1x4x1xf32>,
    } else {
    }
    return
  }
  func.func @transform_0(%arg0: i32, %arg1: i32) -> (i32, i32, i32) {
    %c0_i32 = arith.constant 0 : i32
    %c0_i32_0 = arith.constant 0 : i32
    return %arg0, %c0_i32, %arg1 : i32, i32, i32
  }
  func.func @transform_1(%arg0: i32, %arg1: i32) -> (i32, i32) {
    %c0_i32 = arith.constant 0 : i32
    %c0_i32_0 = arith.constant 0 : i32
    %c0_i32_1 = arith.constant 0 : i32
    return %c0_i32, %c0_i32_0 : i32, i32
  }
  func.func @transform_2(%arg0: i32, %arg1: i32) -> (i32, i32) {
    %c0_i32 = arith.constant 0 : i32
    %c0_i32_0 = arith.constant 0 : i32
    %c0_i32_1 = arith.constant 0 : i32
    return %c0_i32, %c0_i32_0 : i32, i32
  }
  func.func @transform_3(%arg0: i32, %arg1: i32) -> (i32, i32, i32) {
    %c0_i32 = arith.constant 0 : i32
    %c0_i32_0 = arith.constant 0 : i32
    %c0_i32_1 = arith.constant 0 : i32
    return %arg0, %c0_i32, %c0_i32_0 : i32, i32, i32
  }
}

</mosaic_0001>

<bundles_post_ra>
// kernel: tpu_custom_call.1
= control target key start
LH: loop header
LB: loop body
LE: loop exit
PB: predicated region body
PF: predicated region fallthrough
CT: control target
= control target key end

     0   :  { %8 = vsyncpa [#allocation6], 0  ;;  %s666_s0 = inlined_call_operand.hbm [shape: f32[2,4,256], index: 0, kind: input, shape index: {}]   ;;  %s667_s1 = inlined_call_operand.vmem [shape: f32[4,1], index: 1, kind: input, shape index: {}]   ;;  %s668_s2 = inlined_call_operand.vmem [shape: f32[4,1], index: 2, kind: input, shape index: {}]   ;;  %s669_s3 = inlined_call_operand.vmem [shape: f32[2,4,1], index: 3, kind: output, shape index: {}]  }
   0x1   :  { %10 = vsyncpa [#allocation6 + $0x1], 0  ;;  %s528_s12 = smov 0   ;;  %s530_s13 = smov 0  }
   0x2   :  { %s532_s14 = smov 0   ;;  %s534_s15 = smov 0  }
   0x3   :  { %s536_s16 = smov 0   ;;  %s538_s17 = smov 0  }
   0x4 LB: > { %s348_s18 = sadd.s32 4294967295, %s503_s17   ;;  %s28_s19 = sadd.s32 1, %s499_s16  ;;  %s503_s17 = sphi %s538_s17, %s16_s17   ;;  %s499_s16 = sphi %s536_s16, %s679_s16   ;;  %s495_s15 = sphi %s534_s15, %s678_s15   ;;  %s491_s14 = sphi %s532_s14, %s677_s14   ;;  %s487_s13 = sphi %s530_s13, %s676_s13   ;;  %s483_s12 = sphi %s528_s12, %s675_s12  }
   0x5   : > { %p30_p0 = scmp.ge.s32.totalorder %s28_s19, 2  ;;  %s37_s20 = sadd.s32 1, %s491_s14 }
   0x6   : > { %p44_p1 = scmp.ne.s32.totalorder %s491_s14, %s487_s13  ;;  %p45_p2 = scmp.eq.s32.totalorder %s503_s17, 0 }
   0x7   : > { %s681_s19 = smov (%p30_p0, %s28_s19), 0  ;;  %p50_p4 = scmp.ne.s32.totalorder %s487_s13, %s483_s12 }
   0x8   : > { %p564_p3 = por %p45_p2, %p44_p1  ;;  %s32_s22 = ssub.s32 %s499_s16, %s681_s19 }
   0x9   : > { %p51_p5 = scmp.eq.s32.totalorder %s348_s18, 0  ;;  %p35_p6 = scmp.eq.s32.totalorder %s32_s22, 0 }
   0xa   : > { %p367_p8 = scmp.lt.s32.totalorder %s503_s17, 2  ;;  %s148_s25 = sand.u32 1, %s491_s14  }
   0xb   : > { %p571_p7 = por %p51_p5, %p50_p4  ;;  %s360_s26 = sshll.u32 %s499_s16, 7 }
   0xc   : > { %s577_s24 = scalar_select %p35_p6, %s491_s14, %s37_s20  }
   0xd   : > { %s352_s27 = sshll.u32 %s148_s25, 3  ;;  %s584_s30 = scalar_lea.hbm %s666_s0, %s360_s26 }
   0xe   : > { %s152_s4 = scalar_lea.vmem [#allocation5], %s352_s27  ;;  %p588_p9 = pnand %p367_p8, %p564_p3 }
   0xf   : > { %s162_s5 = sshll.u32 %s152_s4, 4  ;;  %s149_s7 = scalar_lea.sflag [#allocation6], %s148_s25  ;;  %s592_s5 = int_to_ptr.vmem [resolvable:$true] %s162_s5 }
  0x10   : > { %s423_s8 = scalar_lea.hbm %s584_s30, 128  ;;  %p425_p13 = pneg %p588_p9 }
  0x11   : > { %p424_p12 = scmp.ne.s32.totalorder %s584_s30, %s423_s8  ;;  %s428_s11 = scalar_lea.hbm %s666_s0, 256 }
  0x12   : > { %p429_p2 = scmp.lt.u32.totalorder %s584_s30, %s666_s0  ;;  %p430_p3 = scmp.lt.u32.totalorder %s428_s11, %s423_s8 }
  0x13   : > { %p426_p0 = pnand %p425_p13, %p424_p12  ;;  %p432_p5 = scmp.lt.u32.totalorder %s423_s8, %s584_s30 }
  0x14   : > { %p431_p4 = por %p430_p3, %p429_p2 }
  0x15   : > { %p427_p1 = pneg %p426_p0 }
  0x16   : > { %p433_p6 = por %p432_p5, %p431_p4 }
  0x18   : > { %p434_p8 = pnand %p433_p6, %p427_p1 }
  0x1a   : > { %437 = shalt.err (!%p434_p8)
}
  0x1b   : > { %s438_s20 = scalar_lea.vmem %s592_s5, 128  ;;  %s505_s21 = smov [#allocation5]  }
  0x1c   : > { %p439_p12 = scmp.ne.s32.totalorder %s592_s5, %s438_s20  ;;  %s443_s22 = sshll.u32 %s505_s21, 4  ;;  %s444_s22 = int_to_ptr.vmem [resolvable:$false] %s443_s22 }
  0x1d   : > { %s445_s25 = scalar_lea.vmem %s444_s22, 256  ;;  %p446_p11 = scmp.lt.s32.totalorder %s592_s5, %s444_s22 }
  0x1e   : > { %p441_p0 = pnand %p439_p12, %p425_p13  ;;  %p447_p2 = scmp.lt.s32.totalorder %s445_s25, %s438_s20 }
  0x20   : > { %p442_p10 = pneg %p441_p0  ;;  %p448_p3 = por %p447_p2, %p446_p11 }
  0x22   : > { %p449_p4 = pnand %p448_p3, %p442_p10 }
  0x24   : > { %452 = shalt.err (!%p449_p4)
}
  0x25   : > { %366 = dma.hbm_to_vmem [thread:$0]  (!%p588_p9), %s584_s30, 128, %s592_s5, %s149_s7  }
  0x26   : > { %p673_p1 = scmp.lt.s32.totalorder %s503_s17, 3  ;;  %p674_p5 = scmp.ge.s32.totalorder %s503_s17, 1 }
  0x28   : > { %p168_p13 = pnand %p674_p5, %p673_p1 }
  0x29   : > { %s173_s26 = sand.u32 (!%p168_p13), 1, %s487_s13  }
  0x2a   : > { %171 = sbr.rel (%p168_p13) target bundleno = 264 (0x108), region = 32  ;;  %s356_s27 = sshll.u32 (!%p168_p13), %s173_s26, 3 }
  0x2b   : > { %s174_s28 = scalar_lea.sflag (!%p168_p13), [#allocation6], %s173_s26  ;;  %s177_s29 = scalar_lea.vmem (!%p168_p13), [#allocation5], %s356_s27 }
  0x31   : > { %478 = dma.done.wait (%p571_p7), %s174_s28, 128  }
  0x32   : > { %480 = vsyncadd (%p571_p7), %s174_s28, 4294967168  ;;  %vm209_vm0 = vcmask 3072   ;;  %v506_v0 = vmov 0.0   ;;  %vm217_vm1 = vcmask 1043456   ;;  %v204_v1 = vld [vmem:[%s177_s29] sm:$0xff]  ;;  %v507_v9 = vmov -inf  }
  0x33   : > { %210 = vst.msk [vmem:[#allocation2] sm:$0xf] %vm209_vm0, %v506_v0  ;;  %v215_v2 = vcombine.high %v204_v1, %v204_v1  ;;  %v218_v3 = vsel %vm217_vm1, %v204_v1, 0.0  ;;  %v227_v5 = vsel %vm217_vm1, %v204_v1, -inf  ;;  %211 = vst.msk [vmem:[#allocation3] sm:$0xf] %vm209_vm0, %v507_v9 }
  0x34   : > { %v240_v16 = vld [vmem:[%s667_s1] sm:$0xf]  ;;  %p200_p7 = scmp.lt.s32.totalorder %s495_s15, 1 }
  0x35   : > { %v219_v4 = vsel %vm217_vm1, %v215_v2, 0.0  ;;  %v228_v6 = vsel %vm217_vm1, %v215_v2, -inf  ;;  %v241_v37 = vld [vmem:[%s668_s2] sm:$0xf] }
  0x36   : > { %v220_v7 = vadd.f32 %v219_v4, %v218_v3  ;;  %v229_v8 = vmax.f32 %v227_v5, %v228_v6  ;;  %s683_s15 = smov (!%p200_p7, %s495_s15), 1 }
  0x37   : > { %s357_s6 = sshll.u32 %s683_s15, 2 }
  0x38   : > { %221 = vadd.xlane.f32.xlu0 %v220_v7  ;;  %s203_s9 = scalar_lea.vmem %s669_s3, %s357_s6 }
  0x3a   : > { %v213_v10 = vld [vmem:[#allocation2] sm:$0xf]  ;;  %v226_v13 = vld [vmem:[#allocation3] sm:$0xf] }
  0x3c   : > { %230 = vmax.xlane.f32.xlu0 %v229_v8 }
  0xc5   : > { %v222_v11 = vpop.xlane.xlu0 %221 }
  0xc6   : > { %v223_v12 = vadd.f32 %v222_v11, %v213_v10 }
  0xc8   : > { %225 = vst.msk [vmem:[#allocation2] sm:$0xf] %vm209_vm0, %v223_v12 }
  0xc9   : > { %v231_v14 = vpop.xlane.xlu0 %230 }
  0xca   : > { %v232_v15 = vmax.f32 %v226_v13, %v231_v14 }
  0xcc   : > { %233 = vst.msk [vmem:[#allocation3] sm:$0xf] %vm209_vm0, %v232_v15 }
  0xcf   : > { %v237_v17 = vld [vmem:[#allocation2] sm:$0xf] }
  0xd0   : > { %v238_v18 = vmul.f32 0.00390625, %v237_v17 }
  0xd2   : > { %v242_v19 = vmul.f32 %v240_v16, %v238_v18 }
  0xd3   : > { %v239_v20 = vld [vmem:[#allocation3] sm:$0xf] }
  0xd4   : > { %v243_v21 = vsel %vm209_vm0, %v242_v19, 0.0  ;;  %v253_v22 = vmul.f32 %v240_v16, %v239_v20 }
  0xd5   : > { %v244_v23 = vrot.slane %v243_v21, 4 }
  0xd6   : > { %v254_v24 = vsel %vm209_vm0, %v253_v22, 0.0 }
  0xd7   : > { %v245_v25 = vadd.f32 %v244_v23, %v243_v21  ;;  %v255_v26 = vrot.slane %v254_v24, 4 }
  0xd9   : > { %v246_v27 = vrot.slane %v245_v25, 2  ;;  %v256_v28 = vadd.f32 %v255_v26, %v254_v24 }
  0xdb   : > { %v247_v29 = vadd.f32 %v246_v27, %v245_v25  ;;  %v257_v30 = vrot.slane %v256_v28, 2 }
  0xdd   : > { %v248_v31 = vrot.slane %v247_v29, 1  ;;  %v258_v32 = vadd.f32 %v257_v30, %v256_v28 }
  0xdf   : > { %v249_v33 = vadd.f32 %v248_v31, %v247_v29  ;;  %v259_v34 = vrot.slane %v258_v32, 1 }
  0xe1   : > { %v250_v35 = vmax.f32 %v249_v33, 0.0  ;;  %v260_v36 = vadd.f32 %v259_v34, %v258_v32 }
  0xe3   : > { %v261_v38 = vmax.f32 %v260_v36, 0.0  ;;  %v251_v39 = vmul.f32 %v250_v35, %v241_v37 }
  0xe5   : > { %v262_v40 = vmul.f32 %v261_v38, %v241_v37 }
  0xe7   : > { %v263_v41 = vadd.f32 %v262_v40, %v251_v39 }
  0xe9   : > { %v264_v42 = vsub.f32 0.0, %v263_v41 }
  0xeb   : > { %v265_v43 = vmul.f32 1.442695, %v264_v42 }
  0xed   : > { %419 = vpow2.f32 %v265_v43 }
  0xf7   : > { %v420_v44 = vpop.eup %419 }
  0xf8   : > { %v267_v45 = vadd.f32 1.0, %v420_v44 }
  0xfa   : > { %421 = vrcp.f32 %v267_v45 }
 0x104   : > { %v422_v46 = vpop.eup %421 }
 0x105   : > { %v270_v47 = vadd.f32 1.0, %v422_v46 }
 0x107   : > { %271 = vst.msk [vmem:[%s203_s9] sm:$0xf] %vm209_vm0, %v270_v47 }
 0x108 PF: > { %s16_s17 = sadd.s32 1, %s503_s17   ;;  %s675_s12 = smov %s487_s13 }
 0x109   : > { %p13_p9 = scmp.ge.s32.totalorder %s16_s17, 4   ;;  %s676_s13 = smov %s491_s14 }
 0x10a   : > { %s677_s14 = smov %s577_s24  ;;  %s678_s15 = smov %s499_s16 }
 0x10b   : > { %s679_s16 = smov %s681_s19  ;;  %15 = sbr.rel (!%p13_p9) target bundleno = 4 (0x4), region = 80 }
 0x112   :  { %291 = vsyncpa [#allocation6], 1 }
 0x113   :  { %293 = vsyncpa [#allocation6 + $0x1], 1 }

</bundles_post_ra>
